<compile_context>
chip_gen: v7x
topology: tpu7x:2x2x1
jax: 0.10.0
libtpu: 0.0.40
codegen_flags: <defaults>
</compile_context>

<pallas_src>
import jax
import jax.numpy as jnp
from jax.experimental import pallas as pl
from jax.experimental.pallas import tpu as pltpu

LN_EPS = 1e-5          # PyTorch nn.LayerNorm default eps
HEAD_PAD = 128         # lane-dense fused head output width
BRANCH_HALF = 64       # width of each LayerNorm'd branch
SUBLANE = 16           # bf16 sublane tile (input / output blocks are bf16)


def _round_up(x, m):
    return ((x + m - 1) // m) * m


def _dual_layernorm_hat(hb, half):
    """Per-half LayerNorm (no affine) over lanes [0:half) and [half:2*half).

    Lane-dense: full-width reductions + one masked reduction per pass; the
    "hi" half statistics are derived by subtraction (sum_hi = full - lo),
    so only 2 masked selects remain on the VPU/XLU path.
    gamma/beta are folded into the fused head weights outside the kernel.
    """
    lane = jax.lax.broadcasted_iota(jnp.int32, hb.shape, 1)
    is_lo = lane < half
    inv_n = 1.0 / float(half)

    sum_full = jnp.sum(hb, axis=-1, keepdims=True)
    sum_lo = jnp.sum(jnp.where(is_lo, hb, 0.0), axis=-1, keepdims=True)
    mean = jnp.where(is_lo, sum_lo, sum_full - sum_lo) * inv_n

    centered = hb - mean
    csq = centered * centered
    csq_full = jnp.sum(csq, axis=-1, keepdims=True)
    csq_lo = jnp.sum(jnp.where(is_lo, csq, 0.0), axis=-1, keepdims=True)
    var = jnp.where(is_lo, csq_lo, csq_full - csq_lo) * inv_n

    # NOTE: padded (all-zero) batch rows can ReLU to all-zero -> var == 0, but
    # centered == 0 so the output stays finite (0 * rsqrt(eps)); padded rows
    # are sliced off in the wrapper, so this is benign by construction.
    return centered * jax.lax.rsqrt(var + LN_EPS)


def actor_critic_kernel(x_ref, w1_ref, b1_ref, w2_ref, b2_ref,
                        wb_ref, bb_ref, wh_ref, bh_ref, out_ref):
    # shared trunk (bf16 MXU matmuls, f32 accumulation / elementwise)
    x = x_ref[...]                                   # already bf16
    h1 = jnp.dot(x, w1_ref[...], preferred_element_type=jnp.float32) + b1_ref[...]
    h1 = jnp.maximum(h1, 0.0)
    h2 = jnp.dot(h1.astype(jnp.bfloat16), w2_ref[...],
                 preferred_element_type=jnp.float32) + b2_ref[...]
    h2 = jnp.maximum(h2, 0.0)

    # fused policy|value projection: one lane-dense 128->128 matmul
    hb = jnp.dot(h2.astype(jnp.bfloat16), wb_ref[...],
                 preferred_element_type=jnp.float32) + bb_ref[...]
    hb = jnp.maximum(hb, 0.0)

    # per-branch LayerNorm "hat" (gamma/beta folded into the fused head)
    xhat = _dual_layernorm_hat(hb, BRANCH_HALF)

    # fused block-diagonal head: logits in lanes [0:A), value in lane A, rest 0
    out = jnp.dot(xhat.astype(jnp.bfloat16), wh_ref[...],
                  preferred_element_type=jnp.float32) + bh_ref[...]
    out_ref[...] = out.astype(out_ref.dtype)         # bf16 lane-dense writeback


def prepare_fused_params(params):
    """Offline param prep: concat branch weights, fold LN affine into the
    block-diagonal fused head, cast weights to bf16 (biases stay f32)."""
    f32, bf16 = jnp.float32, jnp.bfloat16
    action_dim = params["policy_head_w"].shape[1]
    assert action_dim + 1 <= HEAD_PAD, (
        f"fused head needs action_dim + 1 <= {HEAD_PAD}, got {action_dim + 1}")

    # fused 128->128 branch projection (policy | value)
    wb = jnp.concatenate([params["policy_fc_w"], params["value_fc_w"]], axis=1)
    bb = jnp.concatenate([params["policy_fc_b"], params["value_fc_b"]], axis=1)

    gp = params["policy_norm_g"].reshape(-1)
    bp = params["policy_norm_b"].reshape(-1)
    gv = params["value_norm_g"].reshape(-1)
    bv = params["value_norm_b"].reshape(-1)
    wph = params["policy_head_w"]               # (64, A)
    bph = params["policy_head_b"].reshape(-1)   # (A,)
    wvh = params["value_head_w"]                # (64, 1)
    bvh = params["value_head_b"].reshape(-1)    # (1,)

    wh = jnp.zeros((2 * BRANCH_HALF, HEAD_PAD), f32)
    wh = wh.at[:BRANCH_HALF, :action_dim].set(gp[:, None] * wph)
    wh = wh.at[BRANCH_HALF:, action_dim:action_dim + 1].set(gv[:, None] * wvh)
    bh = jnp.zeros((1, HEAD_PAD), f32)
    bh = bh.at[0, :action_dim].set(bp @ wph + bph)
    bh = bh.at[0, action_dim].set((bv @ wvh + bvh)[0])

    return {
        "w1": params["fc1_w"].astype(bf16), "b1": params["fc1_b"].astype(f32),
        "w2": params["fc2_w"].astype(bf16), "b2": params["fc2_b"].astype(f32),
        "wb": wb.astype(bf16), "bb": bb.astype(f32),
        "wh": wh.astype(bf16), "bh": bh.astype(f32),
        "action_dim": action_dim,
    }


def _choose_tile(B, tb):
    """Pick (TB, B_pad): bf16-sublane aligned, and >= 2 grid steps whenever
    possible so v7x's second TensorCore gets work via "parallel" semantics.
    tb defaults to 1024 -> safe inside v5e's 16 MiB scoped-VMEM default; if
    you raise tb past ~2048, set vmem_limit_bytes and re-derive for v7x
    (64 MiB physical / 32 MiB scoped)."""
    B_aligned = _round_up(B, SUBLANE)
    if B_aligned <= SUBLANE:
        return B_aligned, B_aligned
    tb_two_steps = _round_up(pl.cdiv(B_aligned, 2), SUBLANE)
    TB = max(SUBLANE, min(tb, tb_two_steps))
    B_pad = _round_up(B_aligned, TB)
    return TB, B_pad


def actor_critic_forward(x, fused, *, tb=1024):
    B, input_dim = x.shape
    action_dim = fused["action_dim"]

    TB, B_pad = _choose_tile(B, tb)

    # stream the input in bf16 (fc1 is computed in bf16 anyway)
    x_bf16 = x.astype(jnp.bfloat16)
    if B_pad != B:
        x_bf16 = jnp.pad(x_bf16, ((0, B_pad - B), (0, 0)))
    grid = (B_pad // TB,)

    weights = [fused["w1"], fused["b1"], fused["w2"], fused["b2"],
               fused["wb"], fused["bb"], fused["wh"], fused["bh"]]

    def const_spec(a):
        # full-array block, constant index_map -> resident across grid steps
        zeros = (0,) * a.ndim
        return pl.BlockSpec(a.shape, lambda i, z=zeros: z)

    flops = 2 * B_pad * (input_dim * 256 + 256 * 128 + 128 * 128
                         + 128 * HEAD_PAD)
    bytes_accessed = (x_bf16.size * x_bf16.dtype.itemsize
                      + sum(int(a.size) * a.dtype.itemsize for a in weights)
                      + B_pad * HEAD_PAD * 2)          # bf16 writeback
    cost = pl.CostEstimate(flops=flops,
                           transcendentals=B_pad * 2,   # 2 rsqrt per row
                           bytes_accessed=bytes_accessed)

    out = pl.pallas_call(
        actor_critic_kernel,
        out_shape=jax.ShapeDtypeStruct((B_pad, HEAD_PAD), jnp.bfloat16),
        grid=grid,
        in_specs=[pl.BlockSpec((TB, input_dim), lambda i: (i, 0))]
                 + [const_spec(a) for a in weights],
        out_specs=pl.BlockSpec((TB, HEAD_PAD), lambda i: (i, 0)),
        compiler_params=pltpu.CompilerParams(
            dimension_semantics=("parallel",)),
        cost_estimate=cost,
    )(x_bf16, *weights)

    logits = out[:B, :action_dim].astype(jnp.float32)
    value = out[:B, action_dim:action_dim + 1].astype(jnp.float32)
    return logits, value


def init_params(key, input_dim, action_dim):
    """Deterministic synthetic parameters (same shapes as the PyTorch module)."""
    def linear(k, fan_in, fan_out):
        kw, kb = jax.random.split(k)
        bound = 1.0 / jnp.sqrt(fan_in)
        w = jax.random.uniform(kw, (fan_in, fan_out), jnp.float32, -bound, bound)
        b = jax.random.uniform(kb, (1, fan_out), jnp.float32, -bound, bound)
        return w, b

    keys = jax.random.split(key, 6)
    p = {}
    p["fc1_w"], p["fc1_b"] = linear(keys[0], input_dim, 256)
    p["fc2_w"], p["fc2_b"] = linear(keys[1], 256, 128)
    p["policy_fc_w"], p["policy_fc_b"] = linear(keys[2], 128, 64)
    p["policy_head_w"], p["policy_head_b"] = linear(keys[3], 64, action_dim)
    p["value_fc_w"], p["value_fc_b"] = linear(keys[4], 128, 64)
    p["value_head_w"], p["value_head_b"] = linear(keys[5], 64, 1)
    # LayerNorm defaults: weight=1, bias=0
    p["policy_norm_g"] = jnp.ones((1, 64), jnp.float32)
    p["policy_norm_b"] = jnp.zeros((1, 64), jnp.float32)
    p["value_norm_g"] = jnp.ones((1, 64), jnp.float32)
    p["value_norm_b"] = jnp.zeros((1, 64), jnp.float32)
    return p


def reference_forward(x, params):
    """Pure-JAX f32 reference matching the PyTorch module."""
    def ln(v, g, b):
        m = jnp.mean(v, axis=-1, keepdims=True)
        c = v - m
        var = jnp.mean(c * c, axis=-1, keepdims=True)
        return c * jax.lax.rsqrt(var + LN_EPS) * g + b

    h = jnp.maximum(x @ params["fc1_w"] + params["fc1_b"], 0.0)
    h = jnp.maximum(h @ params["fc2_w"] + params["fc2_b"], 0.0)
    p = jnp.maximum(h @ params["policy_fc_w"] + params["policy_fc_b"], 0.0)
    p = ln(p, params["policy_norm_g"], params["policy_norm_b"])
    logits = p @ params["policy_head_w"] + params["policy_head_b"]
    v = jnp.maximum(h @ params["value_fc_w"] + params["value_fc_b"], 0.0)
    v = ln(v, params["value_norm_g"], params["value_norm_b"])
    value = v @ params["value_head_w"] + params["value_head_b"]
    return logits, value


if __name__ == "__main__":
    B, INPUT_DIM, ACTION_DIM = 8, 32, 4

    key = jax.random.PRNGKey(0)
    kx, kp = jax.random.split(key)
    x = jax.random.normal(kx, (B, INPUT_DIM), jnp.float32)
    params = init_params(kp, INPUT_DIM, ACTION_DIM)
    fused = prepare_fused_params(params)

    logits, value = actor_critic_forward(x, fused)
    jax.block_until_ready((logits, value))

    assert logits.shape == (B, ACTION_DIM)
    assert value.shape == (B, 1)

    # sanity check against f32 reference
    # (loose tolerance: bf16 input / weights / activations / output stream)
    ref_logits, ref_value = reference_forward(x, params)
    assert float(jnp.max(jnp.abs(logits - ref_logits))) < 0.25
    assert float(jnp.max(jnp.abs(value - ref_value))) < 0.25

    print("KERNEL_OK")
</pallas_src>

<mosaic_0001>
module attributes {stable_mosaic.version = 11 : i64} {
  func.func @actor_critic_kernel(%arg0: i32, %arg1: memref<16x32xbf16, #tpu.memory_space<vmem>>, %arg2: memref<32x256xbf16, #tpu.memory_space<vmem>>, %arg3: memref<1x256xf32, #tpu.memory_space<vmem>>, %arg4: memref<256x128xbf16, #tpu.memory_space<vmem>>, %arg5: memref<1x128xf32, #tpu.memory_space<vmem>>, %arg6: memref<128x128xbf16, #tpu.memory_space<vmem>>, %arg7: memref<1x128xf32, #tpu.memory_space<vmem>>, %arg8: memref<128x128xbf16, #tpu.memory_space<vmem>>, %arg9: memref<1x128xf32, #tpu.memory_space<vmem>>, %arg10: memref<16x128xbf16, #tpu.memory_space<vmem>>) attributes {dimension_semantics = [#tpu.dimension_semantics<parallel>], iteration_bounds = array<i64: 1>, scalar_prefetch = 0 : i64, scratch_operands = 0 : i64, tpu.core_type = #tpu.core_type<tc>, window_params = [{transform_indices = @transform_0, window_bounds = array<i64: 16, 32>}, {pipeline_mode = #tpu.pipeline_mode<synchronous>, transform_indices = @transform_1, window_bounds = array<i64: 32, 256>}, {pipeline_mode = #tpu.pipeline_mode<synchronous>, transform_indices = @transform_2, window_bounds = array<i64: 1, 256>}, {pipeline_mode = #tpu.pipeline_mode<synchronous>, transform_indices = @transform_3, window_bounds = array<i64: 256, 128>}, {pipeline_mode = #tpu.pipeline_mode<synchronous>, transform_indices = @transform_4, window_bounds = array<i64: 1, 128>}, {pipeline_mode = #tpu.pipeline_mode<synchronous>, transform_indices = @transform_5, window_bounds = array<i64: 128, 128>}, {pipeline_mode = #tpu.pipeline_mode<synchronous>, transform_indices = @transform_6, window_bounds = array<i64: 1, 128>}, {pipeline_mode = #tpu.pipeline_mode<synchronous>, transform_indices = @transform_7, window_bounds = array<i64: 128, 128>}, {pipeline_mode = #tpu.pipeline_mode<synchronous>, transform_indices = @transform_8, window_bounds = array<i64: 1, 128>}, {transform_indices = @transform_9, window_bounds = array<i64: 16, 128>}]} {
    %c0 = arith.constant 0 : index
    %c0_0 = arith.constant 0 : index
    %0 = vector.load %arg1[%c0, %c0_0] : memref<16x32xbf16, #tpu.memory_space<vmem>>, vector<16x32xbf16>
    %c0_1 = arith.constant 0 : index
    %c0_2 = arith.constant 0 : index
    %1 = vector.load %arg2[%c0_1, %c0_2] : memref<32x256xbf16, #tpu.memory_space<vmem>>, vector<32x256xbf16>
    %cst = arith.constant dense<0.000000e+00> : vector<16x256xf32>
    %2 = tpu.matmul %0, %1, %cst {dimension_numbers = #tpu.dot_dimension_numbers<[1], [0], [0], [1], [0, 0, 1, 1], [], []>} : vector<16x32xbf16>, vector<32x256xbf16>, vector<16x256xf32> -> vector<16x256xf32>
    %c0_3 = arith.constant 0 : index
    %c0_4 = arith.constant 0 : index
    %3 = vector.load %arg3[%c0_3, %c0_4] : memref<1x256xf32, #tpu.memory_space<vmem>>, vector<1x256xf32>
    %4 = vector.broadcast %3 : vector<1x256xf32> to vector<16x256xf32>
    %5 = arith.addf %2, %4 : vector<16x256xf32>
    %cst_5 = arith.constant 0.000000e+00 : f32
    %6 = vector.broadcast %cst_5 : f32 to vector<16x256xf32>
    %7 = arith.maximumf %5, %6 : vector<16x256xf32>
    %8 = arith.truncf %7 : vector<16x256xf32> to vector<16x256xbf16>
    %c0_6 = arith.constant 0 : index
    %c0_7 = arith.constant 0 : index
    %9 = vector.load %arg4[%c0_6, %c0_7] : memref<256x128xbf16, #tpu.memory_space<vmem>>, vector<256x128xbf16>
    %cst_8 = arith.constant dense<0.000000e+00> : vector<16x128xf32>
    %10 = tpu.matmul %8, %9, %cst_8 {dimension_numbers = #tpu.dot_dimension_numbers<[1], [0], [0], [1], [0, 0, 1, 1], [], []>} : vector<16x256xbf16>, vector<256x128xbf16>, vector<16x128xf32> -> vector<16x128xf32>
    %c0_9 = arith.constant 0 : index
    %c0_10 = arith.constant 0 : index
    %11 = vector.load %arg5[%c0_9, %c0_10] : memref<1x128xf32, #tpu.memory_space<vmem>>, vector<1x128xf32>
    %12 = vector.broadcast %11 : vector<1x128xf32> to vector<16x128xf32>
    %13 = arith.addf %10, %12 : vector<16x128xf32>
    %cst_11 = arith.constant 0.000000e+00 : f32
    %14 = vector.broadcast %cst_11 : f32 to vector<16x128xf32>
    %15 = arith.maximumf %13, %14 : vector<16x128xf32>
    %16 = arith.truncf %15 : vector<16x128xf32> to vector<16x128xbf16>
    %c0_12 = arith.constant 0 : index
    %c0_13 = arith.constant 0 : index
    %17 = vector.load %arg6[%c0_12, %c0_13] : memref<128x128xbf16, #tpu.memory_space<vmem>>, vector<128x128xbf16>
    %cst_14 = arith.constant dense<0.000000e+00> : vector<16x128xf32>
    %18 = tpu.matmul %16, %17, %cst_14 {dimension_numbers = #tpu.dot_dimension_numbers<[1], [0], [0], [1], [0, 0, 1, 1], [], []>} : vector<16x128xbf16>, vector<128x128xbf16>, vector<16x128xf32> -> vector<16x128xf32>
    %c0_15 = arith.constant 0 : index
    %c0_16 = arith.constant 0 : index
    %19 = vector.load %arg7[%c0_15, %c0_16] : memref<1x128xf32, #tpu.memory_space<vmem>>, vector<1x128xf32>
    %20 = vector.broadcast %19 : vector<1x128xf32> to vector<16x128xf32>
    %21 = arith.addf %18, %20 : vector<16x128xf32>
    %cst_17 = arith.constant 0.000000e+00 : f32
    %22 = vector.broadcast %cst_17 : f32 to vector<16x128xf32>
    %23 = arith.maximumf %21, %22 : vector<16x128xf32>
    %24 = tpu.iota {dimensions = array<i32: 1>} : vector<16x128xi32>
    %c64_i32 = arith.constant 64 : i32
    %25 = vector.broadcast %c64_i32 : i32 to vector<16x128xi32>
    %26 = arith.cmpi slt, %24, %25 : vector<16x128xi32>
    %cst_18 = arith.constant dense<0.000000e+00> : vector<16xf32>
    %27 = vector.multi_reduction <add>, %23, %cst_18 [1] : vector<16x128xf32> to vector<16xf32>
    %28 = vector.shape_cast %27 : vector<16xf32> to vector<16x1xf32>
    %cst_19 = arith.constant 0.000000e+00 : f32
    %29 = vector.broadcast %cst_19 : f32 to vector<16x128xf32>
    %30 = arith.select %26, %23, %29 : vector<16x128xi1>, vector<16x128xf32>
    %cst_20 = arith.constant dense<0.000000e+00> : vector<16xf32>
    %31 = vector.multi_reduction <add>, %30, %cst_20 [1] : vector<16x128xf32> to vector<16xf32>
    %32 = vector.shape_cast %31 : vector<16xf32> to vector<16x1xf32>
    %33 = arith.subf %28, %32 : vector<16x1xf32>
    %34 = vector.shape_cast %32 : vector<16x1xf32> to vector<16x1xf32>
    %35 = vector.broadcast %34 : vector<16x1xf32> to vector<16x128xf32>
    %36 = vector.shape_cast %33 : vector<16x1xf32> to vector<16x1xf32>
    %37 = vector.broadcast %36 : vector<16x1xf32> to vector<16x128xf32>
    %38 = arith.select %26, %35, %37 : vector<16x128xi1>, vector<16x128xf32>
    %cst_21 = arith.constant 1.562500e-02 : f32
    %39 = vector.broadcast %cst_21 : f32 to vector<16x128xf32>
    %40 = arith.mulf %38, %39 : vector<16x128xf32>
    %41 = arith.subf %23, %40 : vector<16x128xf32>
    %42 = arith.mulf %41, %41 : vector<16x128xf32>
    %cst_22 = arith.constant dense<0.000000e+00> : vector<16xf32>
    %43 = vector.multi_reduction <add>, %42, %cst_22 [1] : vector<16x128xf32> to vector<16xf32>
    %44 = vector.shape_cast %43 : vector<16xf32> to vector<16x1xf32>
    %cst_23 = arith.constant 0.000000e+00 : f32
    %45 = vector.broadcast %cst_23 : f32 to vector<16x128xf32>
    %46 = arith.select %26, %42, %45 : vector<16x128xi1>, vector<16x128xf32>
    %cst_24 = arith.constant dense<0.000000e+00> : vector<16xf32>
    %47 = vector.multi_reduction <add>, %46, %cst_24 [1] : vector<16x128xf32> to vector<16xf32>
    %48 = vector.shape_cast %47 : vector<16xf32> to vector<16x1xf32>
    %49 = arith.subf %44, %48 : vector<16x1xf32>
    %50 = vector.shape_cast %48 : vector<16x1xf32> to vector<16x1xf32>
    %51 = vector.broadcast %50 : vector<16x1xf32> to vector<16x128xf32>
    %52 = vector.shape_cast %49 : vector<16x1xf32> to vector<16x1xf32>
    %53 = vector.broadcast %52 : vector<16x1xf32> to vector<16x128xf32>
    %54 = arith.select %26, %51, %53 : vector<16x128xi1>, vector<16x128xf32>
    %cst_25 = arith.constant 1.562500e-02 : f32
    %55 = vector.broadcast %cst_25 : f32 to vector<16x128xf32>
    %56 = arith.mulf %54, %55 : vector<16x128xf32>
    %cst_26 = arith.constant 9.99999974E-6 : f32
    %57 = vector.broadcast %cst_26 : f32 to vector<16x128xf32>
    %58 = arith.addf %56, %57 : vector<16x128xf32>
    %59 = math.rsqrt %58 : vector<16x128xf32>
    %60 = arith.mulf %41, %59 : vector<16x128xf32>
    %61 = arith.truncf %60 : vector<16x128xf32> to vector<16x128xbf16>
    %c0_27 = arith.constant 0 : index
    %c0_28 = arith.constant 0 : index
    %62 = vector.load %arg8[%c0_27, %c0_28] : memref<128x128xbf16, #tpu.memory_space<vmem>>, vector<128x128xbf16>
    %cst_29 = arith.constant dense<0.000000e+00> : vector<16x128xf32>
    %63 = tpu.matmul %61, %62, %cst_29 {dimension_numbers = #tpu.dot_dimension_numbers<[1], [0], [0], [1], [0, 0, 1, 1], [], []>} : vector<16x128xbf16>, vector<128x128xbf16>, vector<16x128xf32> -> vector<16x128xf32>
    %c0_30 = arith.constant 0 : index
    %c0_31 = arith.constant 0 : index
    %64 = vector.load %arg9[%c0_30, %c0_31] : memref<1x128xf32, #tpu.memory_space<vmem>>, vector<1x128xf32>
    %65 = vector.broadcast %64 : vector<1x128xf32> to vector<16x128xf32>
    %66 = arith.addf %63, %65 : vector<16x128xf32>
    %67 = arith.truncf %66 : vector<16x128xf32> to vector<16x128xbf16>
    %c0_32 = arith.constant 0 : index
    %c0_33 = arith.constant 0 : index
    %68 = vector.load %arg10[%c0_32, %c0_33] : memref<16x128xbf16, #tpu.memory_space<vmem>>, vector<16x128xbf16>
    tpu.vector_store %arg10[%c0_32, %c0_33], %67 {strides = array<i32>} : memref<16x128xbf16, #tpu.memory_space<vmem>>, vector<16x128xbf16>,
    return
  }
  func.func @transform_0(%arg0: i32) -> (i32, i32) {
    %c0_i32 = arith.constant 0 : i32
    %c0_i32_0 = arith.constant 0 : i32
    return %arg0, %c0_i32 : i32, i32
  }
  func.func @transform_1(%arg0: i32) -> (i32, i32) {
    %c0_i32 = arith.constant 0 : i32
    %c0_i32_0 = arith.constant 0 : i32
    %c0_i32_1 = arith.constant 0 : i32
    return %c0_i32, %c0_i32_0 : i32, i32
  }
  func.func @transform_2(%arg0: i32) -> (i32, i32) {
    %c0_i32 = arith.constant 0 : i32
    %c0_i32_0 = arith.constant 0 : i32
    %c0_i32_1 = arith.constant 0 : i32
    return %c0_i32, %c0_i32_0 : i32, i32
  }
  func.func @transform_3(%arg0: i32) -> (i32, i32) {
    %c0_i32 = arith.constant 0 : i32
    %c0_i32_0 = arith.constant 0 : i32
    %c0_i32_1 = arith.constant 0 : i32
    return %c0_i32, %c0_i32_0 : i32, i32
  }
  func.func @transform_4(%arg0: i32) -> (i32, i32) {
    %c0_i32 = arith.constant 0 : i32
    %c0_i32_0 = arith.constant 0 : i32
    %c0_i32_1 = arith.constant 0 : i32
    return %c0_i32, %c0_i32_0 : i32, i32
  }
  func.func @transform_5(%arg0: i32) -> (i32, i32) {
    %c0_i32 = arith.constant 0 : i32
    %c0_i32_0 = arith.constant 0 : i32
    %c0_i32_1 = arith.constant 0 : i32
    return %c0_i32, %c0_i32_0 : i32, i32
  }
  func.func @transform_6(%arg0: i32) -> (i32, i32) {
    %c0_i32 = arith.constant 0 : i32
    %c0_i32_0 = arith.constant 0 : i32
    %c0_i32_1 = arith.constant 0 : i32
    return %c0_i32, %c0_i32_0 : i32, i32
  }
  func.func @transform_7(%arg0: i32) -> (i32, i32) {
    %c0_i32 = arith.constant 0 : i32
    %c0_i32_0 = arith.constant 0 : i32
    %c0_i32_1 = arith.constant 0 : i32
    return %c0_i32, %c0_i32_0 : i32, i32
  }
  func.func @transform_8(%arg0: i32) -> (i32, i32) {
    %c0_i32 = arith.constant 0 : i32
    %c0_i32_0 = arith.constant 0 : i32
    %c0_i32_1 = arith.constant 0 : i32
    return %c0_i32, %c0_i32_0 : i32, i32
  }
  func.func @transform_9(%arg0: i32) -> (i32, i32) {
    %c0_i32 = arith.constant 0 : i32
    %c0_i32_0 = arith.constant 0 : i32
    return %arg0, %c0_i32 : i32, i32
  }
}

</mosaic_0001>

<bundles_post_ra>
// kernel: tpu_custom_call.1
= control target key start
LH: loop header
LB: loop body
LE: loop exit
PB: predicated region body
PF: predicated region fallthrough
CT: control target
= control target key end

     0   :  { %14 = vsyncpa [#allocation3], 0  ;;  %s1203_s0 = inlined_call_operand.hbm [shape: bf16[16,32], index: 0, kind: input, shape index: {}]   ;;  %s1204_s1 = inlined_call_operand.hbm [shape: bf16[32,256], index: 1, kind: input, shape index: {}]   ;;  %s1205_s2 = inlined_call_operand.vmem [shape: f32[1,256], index: 2, kind: input, shape index: {}]   ;;  %s1206_s3 = inlined_call_operand.hbm [shape: bf16[256,128], index: 3, kind: input, shape index: {}]   ;;  %s1207_s4 = inlined_call_operand.vmem [shape: f32[1,128], index: 4, kind: input, shape index: {}]   ;;  %s1208_s5 = inlined_call_operand.hbm [shape: bf16[128,128], index: 5, kind: input, shape index: {}]   ;;  %s1209_s6 = inlined_call_operand.vmem [shape: f32[1,128], index: 6, kind: input, shape index: {}]   ;;  %s1210_s7 = inlined_call_operand.hbm [shape: bf16[128,128], index: 7, kind: input, shape index: {}]   ;;  %s1211_s8 = inlined_call_operand.vmem [shape: f32[1,128], index: 8, kind: input, shape index: {}]   ;;  %s1212_s9 = inlined_call_operand.hbm [shape: bf16[16,128], index: 9, kind: output, shape index: {}]  }
   0x1   :  { %15 = vsyncpa [#allocation6], 0 }
   0x2   :  { %16 = vsyncpa [#allocation9], 0 }
   0x3   :  { %17 = vsyncpa [#allocation4], 0  ;;  %s1004_s30 = smov [#allocation5]   ;;  %s864_s13 = scalar_lea.hbm %s1204_s1, 512 }
   0x4   :  { %s35_s10 = sshll.u32 %s1004_s30, 4  ;;  %p865_p0 = scmp.ne.s32.totalorder %s1204_s1, %s864_s13  ;;  %s36_s10 = int_to_ptr.vmem [resolvable:$true] %s35_s10 }
   0x5   :  { %p868_p1 = scmp.lt.u32.totalorder %s864_s13, %s1204_s1 }
   0x7   :  { %p870_p2 = pnand %p868_p1, %p865_p0 }
   0x9   :  { %873 = shalt.err (!%p870_p2)
}
   0xa   :  { %s874_s18 = scalar_lea.vmem %s36_s10, 512  ;;  %p879_p4 = scmp.lt.s32.totalorder %s36_s10, %s36_s10 }
   0xb   :  { %p875_p3 = scmp.ne.s32.totalorder %s36_s10, %s874_s18  ;;  %p880_p5 = scmp.lt.s32.totalorder %s874_s18, %s874_s18 }
   0xd   :  { %p881_p6 = por %p880_p5, %p879_p4 }
   0xf   :  { %p882_p7 = pnand %p881_p6, %p875_p3 }
  0x11   :  { %885 = shalt.err (!%p882_p7)
}
  0x12   :  { %s1005_s19 = smov 128   ;;  %s1006_s20 = smov 8  }
  0x13   :  { %41 = dma.hbm_to_vmem [thread:$0]  %s1204_s1, 512, %s36_s10, [#allocation6], %s1005_s19, %s1005_s19, %s1006_s20  }
  0x14   :  { %s1007_s23 = smov [#allocation8]   ;;  %s1008_s25 = smov [#allocation2]  }
  0x15   :  { %s63_s24 = sshll.u32 %s1007_s23, 4  ;;  %s23_s26 = sshll.u32 %s1008_s25, 4  ;;  %s64_s24 = int_to_ptr.vmem [resolvable:$true] %s63_s24  ;;  %s24_s26 = int_to_ptr.vmem [resolvable:$true] %s23_s26 }
  0x16   :  { %s886_s29 = scalar_lea.hbm %s1208_s5, 1024 }
  0x17   :  { %p887_p8 = scmp.ne.s32.totalorder %s1208_s5, %s886_s29  ;;  %p890_p9 = scmp.lt.u32.totalorder %s886_s29, %s1208_s5 }
  0x19   :  { %p892_p10 = pnand %p890_p9, %p887_p8 }
  0x1b   :  { %895 = shalt.err (!%p892_p10)
}
  0x1c   :  { %s896_s1 = scalar_lea.vmem %s64_s24, 1024  ;;  %p901_p12 = scmp.lt.s32.totalorder %s64_s24, %s64_s24 }
  0x1d   :  { %p897_p11 = scmp.ne.s32.totalorder %s64_s24, %s896_s1  ;;  %p902_p13 = scmp.lt.s32.totalorder %s896_s1, %s896_s1 }
  0x1f   :  { %p903_p0 = por %p902_p13, %p901_p12 }
  0x21   :  { %p904_p1 = pnand %p903_p0, %p897_p11 }
  0x23   :  { %907 = shalt.err (!%p904_p1)
}
  0x24   :  { %s1009_s10 = smov 64   ;;  %s1010_s14 = smov 4  }
  0x25   :  { %69 = dma.hbm_to_vmem [thread:$0]  %s1208_s5, 1024, %s64_s24, [#allocation9], %s1009_s10, %s1009_s10, %s1010_s14  }
  0x26   :  { %s908_s19 = scalar_lea.hbm %s1203_s0, 128 }
  0x27   :  { %p909_p2 = scmp.ne.s32.totalorder %s1203_s0, %s908_s19  ;;  %p912_p3 = scmp.lt.u32.totalorder %s908_s19, %s1203_s0 }
  0x29   :  { %p914_p4 = pnand %p912_p3, %p909_p2 }
  0x2b   :  { %917 = shalt.err (!%p914_p4)
}
  0x2c   :  { %s918_s25 = scalar_lea.vmem %s24_s26, 128  ;;  %p923_p6 = scmp.lt.s32.totalorder %s24_s26, %s24_s26 }
  0x2d   :  { %p919_p5 = scmp.ne.s32.totalorder %s24_s26, %s918_s25  ;;  %p924_p7 = scmp.lt.s32.totalorder %s918_s25, %s918_s25 }
  0x2f   :  { %p925_p8 = por %p924_p7, %p923_p6 }
  0x31   :  { %p926_p9 = pnand %p925_p8, %p919_p5 }
  0x33   :  { %929 = shalt.err (!%p926_p9)
}
  0x34   :  { %29 = dma.hbm_to_vmem [thread:$0]  %s1203_s0, 128, %s24_s26, [#allocation3], %s1009_s10, %s1009_s10, %s1010_s14  }
  0x35   :  { %s1011_s27 = smov [#allocation7]   ;;  %s1012_s29 = smov [#allocation10]  }
  0x36   :  { %s49_s28 = sshll.u32 %s1011_s27, 4  ;;  %s77_s30 = sshll.u32 %s1012_s29, 4  ;;  %s50_s28 = int_to_ptr.vmem [resolvable:$true] %s49_s28  ;;  %s78_s30 = int_to_ptr.vmem [resolvable:$true] %s77_s30 }
  0x37   :  { %s930_s13 = scalar_lea.hbm %s1206_s3, 2048 }
  0x38   :  { %p931_p10 = scmp.ne.s32.totalorder %s1206_s3, %s930_s13  ;;  %p934_p11 = scmp.lt.u32.totalorder %s930_s13, %s1206_s3 }
  0x3a   :  { %p936_p12 = pnand %p934_p11, %p931_p10 }
  0x3c   :  { %939 = shalt.err (!%p936_p12)
}
  0x3d   :  { %s940_s0 = scalar_lea.vmem %s50_s28, 2048  ;;  %p945_p0 = scmp.lt.s32.totalorder %s50_s28, %s50_s28 }
  0x3e   :  { %p941_p13 = scmp.ne.s32.totalorder %s50_s28, %s940_s0  ;;  %p946_p1 = scmp.lt.s32.totalorder %s940_s0, %s940_s0 }
  0x40   :  { %p947_p2 = por %p946_p1, %p945_p0 }
  0x42   :  { %p948_p3 = pnand %p947_p2, %p941_p13 }
  0x44   :  { %951 = shalt.err (!%p948_p3)
}
  0x45   :  { %55 = dma.hbm_to_vmem [thread:$0]  %s1206_s3, 2048, %s50_s28, [#allocation6], %s1009_s10, %s1009_s10, %s1010_s14  }
  0x46   :  { %s952_s21 = scalar_lea.hbm %s1210_s7, 1024 }
  0x47   :  { %p953_p4 = scmp.ne.s32.totalorder %s1210_s7, %s952_s21  ;;  %p956_p5 = scmp.lt.u32.totalorder %s952_s21, %s1210_s7 }
  0x49   :  { %p958_p6 = pnand %p956_p5, %p953_p4 }
  0x4b   :  { %961 = shalt.err (!%p958_p6)
}
  0x4c   :  { %s962_s24 = scalar_lea.vmem %s78_s30, 1024  ;;  %p967_p8 = scmp.lt.s32.totalorder %s78_s30, %s78_s30 }
  0x4d   :  { %p963_p7 = scmp.ne.s32.totalorder %s78_s30, %s962_s24  ;;  %p968_p9 = scmp.lt.s32.totalorder %s962_s24, %s962_s24 }
  0x4f   :  { %p969_p10 = por %p968_p9, %p967_p8 }
  0x51   :  { %p970_p11 = pnand %p969_p10, %p963_p7 }
  0x53   :  { %973 = shalt.err (!%p970_p11)
}
  0x54   :  { %83 = dma.hbm_to_vmem [thread:$0]  %s1210_s7, 1024, %s78_s30, [#allocation9], %s1009_s10, %s1009_s10, %s1010_s14  }
  0x55   :  { %996 = dma.done.wait [#allocation3], 128  }
  0x56   :  { %997 = vsyncadd [#allocation3], 4294967168 }
  0x57   :  { %998 = dma.done.wait [#allocation6], 2560  }
  0x58   :  { %999 = vsyncadd [#allocation6], 4294964736 }
  0x59   :  { %1000 = dma.done.wait [#allocation9], 2048  }
  0x5a   :  { %1001 = vsyncadd [#allocation9], 4294965248  ;;  %v1013_v0 = vmov 0   ;;  %v821_v1 = vld [vmem:[#allocation5 + $0x4] ss:$8 sps:$4 sm:$0xff]   ;;  %v827_v5 = vld [vmem:[#allocation2] sm:$0xff]   ;;  %v110_v28 = vlaneseq }
  0x5b   :  { %181 = vmatprep.mubr.bf16.mxu0 %v1013_v0  ;;  %v823_v2 = vld [vmem:[#allocation5] ss:$8 sps:$4 sm:$0xff]   ;;  %149 = vmatprep.subr.bf16.mxu0 %v821_v1  ;;  %v824_v3 = vld [vmem:[#allocation5 + $0x14] ss:$8 sps:$4 sm:$0xff]   ;;  %v826_v4 = vld [vmem:[#allocation5 + $0x10] ss:$8 sps:$4 sm:$0xff]  }
  0x5c   :  { %150 = vmatpush1.bf16.msra.mxu0 %v823_v2  ;;  %v828_v6 = vld [vmem:[#allocation7 + $0x40] sm:$0xff]   ;;  %v830_v8 = vld [vmem:[#allocation7 + $0x48] sm:$0xff]   ;;  %vm145_vm0 = vcmask 261120   ;;  %v832_v10 = vld [vmem:[#allocation7 + $0x50] sm:$0xff]   ;;  %v1014_v23 = vmov 0.0   ;;  %v111_v29 = vshrl.u32 %v110_v28, 7 }
  0x5d   :  { %151 = vmatprep.subr.bf16.mxu0 %v824_v3  ;;  %v829_v7 = vld [vmem:[#allocation7] sm:$0xff]   ;;  %728 = vmatprep.subr.bf16.mxu1 %v828_v6  ;;  %v831_v9 = vld [vmem:[#allocation7 + $0x8] sm:$0xff]   ;;  %v833_v11 = vld [vmem:[#allocation7 + $0x10] sm:$0xff]   ;;  %vm1015_vm1 = vmmov 0   ;;  %v1156_v0 = vand.u32 127, %v110_v28  ;;  %s1016_s12 = smov [#allocation11]  }
  0x5e   :  { %729 = vmatpush3.bf16.msra.mxu1 %v829_v7  ;;  %v834_v12 = vld [vmem:[#allocation7 + $0x58] sm:$0xff]   ;;  %v836_v14 = vld [vmem:[#allocation7 + $0x60] sm:$0xff]   ;;  %v838_v16 = vld [vmem:[#allocation7 + $0x68] sm:$0xff]   ;;  %v112_v30 = vsub.s32 0, %v111_v29  ;;  %v116_v32 = vsub.s32 1, %v111_v29  ;;  %s664_s13 = sshll.u32 %s1016_s12, 4  ;;  %s665_s13 = int_to_ptr.vmem [resolvable:$true] %s664_s13 }
  0x5f   :  { %730 = vmatprep.subr.bf16.mxu1 %v830_v8  ;;  %v835_v13 = vld [vmem:[#allocation7 + $0x18] sm:$0xff]   ;;  %v837_v15 = vld [vmem:[#allocation7 + $0x20] sm:$0xff]   ;;  %v839_v17 = vld [vmem:[#allocation7 + $0x28] sm:$0xff]   ;;  %vm493_vm2 = vcmp.lt.s32.totalorder %v1156_v0, 64  ;;  %s974_s1 = scalar_lea.vmem %s665_s13, 128  ;;  %p979_p13 = scmp.lt.s32.totalorder %s665_s13, %s665_s13 }
  0x60   :  { %152 = vmatpush1.bf16.msra.mxu0 %v826_v4  ;;  %v840_v18 = vld [vmem:[#allocation7 + $0x70] sm:$0xff]   ;;  %v842_v20 = vld [vmem:[#allocation7 + $0x78] sm:$0xff]   ;;  %v844_v22 = vld [vmem:[#allocation8] sm:$0xff]   ;;  %p975_p12 = scmp.ne.s32.totalorder %s665_s13, %s974_s1  ;;  %p980_p0 = scmp.lt.s32.totalorder %s974_s1, %s974_s1 }
  0x61   :  { %v841_v19 = vld [vmem:[#allocation7 + $0x30] sm:$0xff]   ;;  %v843_v21 = vld [vmem:[#allocation7 + $0x38] sm:$0xff]   ;;  %768 = vmatprep.subr.bf16.mxu0 %v1014_v23  ;;  %v845_v24 = vld [vmem:[#allocation8 + $0x8] sm:$0xff]  }
  0x62   :  { %731 = vmatpush3.bf16.msra.mxu1 %v831_v9  ;;  %v846_v25 = vld [vmem:[#allocation8 + $0x10] sm:$0xff]   ;;  %v847_v26 = vld [vmem:[#allocation8 + $0x18] sm:$0xff]   ;;  %v848_v27 = vld [vmem:[#allocation8 + $0x20] sm:$0xff]   ;;  %p981_p1 = por %p980_p0, %p979_p13 }
  0x63   :  { %683 = vmatmul.mubr.msk.bf16.vlgmr.msra.gmra.mrb[0].mxu0 %vm145_vm0, %v827_v5  ;;  %732 = vmatprep.subr.bf16.mxu1 %v832_v10  ;;  %v108_v31 = vld [vmem:[%s1205_s2] sm:$0x3]  ;;  %v849_v49 = vld [vmem:[#allocation8 + $0x28] sm:$0xff]   ;;  %v850_v50 = vld [vmem:[#allocation8 + $0x30] sm:$0xff]  }
  0x64   :  { %769 = vmatpush3.bf16.msra.mxu0 %v844_v22  ;;  %v113_v33 = vrot.slane %v108_v31, %v112_v30  ;;  %v117_v34 = vrot.slane %v108_v31, %v116_v32  ;;  %v851_v51 = vld [vmem:[#allocation8 + $0x38] sm:$0xff]   ;;  %784 = vmatprep.mubr.msk.bf16.mxu0 %vm1015_vm1, %v1014_v23  ;;  %v853_v30 = vld [vmem:[#allocation10 + $0x8] sm:$0xff]   ;;  %v854_v31 = vld [vmem:[#allocation10 + $0x10] sm:$0xff]   ;;  %p982_p2 = pnand %p981_p1, %p975_p12 }
  0x65   :  { %770 = vmatprep.subr.bf16.mxu0 %v1014_v23  ;;  %v684_v53 = vld [vmem:[%s1207_s4] ss:$0 sm:$0xff] }
  0x66   :  { %733 = vmatpush3.bf16.msra.mxu1 %v833_v11  ;;  %v701_v1 = vld [vmem:[%s1209_s6] ss:$0 sm:$0xff] }
  0x67   :  { %734 = vmatprep.subr.bf16.mxu1 %v834_v12  ;;  %v852_v12 = vld [vmem:[#allocation10] sm:$0xff]   ;;  %v855_v32 = vld [vmem:[#allocation10 + $0x18] sm:$0xff]  }
  0x68   :  { %771 = vmatpush3.bf16.msra.mxu0 %v845_v24 }
  0x69   :  { %772 = vmatprep.subr.bf16.mxu0 %v1014_v23 }
  0x6a   :  { %735 = vmatpush3.bf16.msra.mxu1 %v835_v13 }
  0x6b   :  { %736 = vmatprep.subr.bf16.mxu1 %v836_v14 }
  0x6c   :  { %773 = vmatpush3.bf16.msra.mxu0 %v846_v25 }
  0x6d   :  { %774 = vmatprep.subr.bf16.mxu0 %v1014_v23 }
  0x6e   :  { %737 = vmatpush3.bf16.msra.mxu1 %v837_v15 }
  0x6f   :  { %738 = vmatprep.subr.bf16.mxu1 %v838_v16 }
  0x70   :  { %775 = vmatpush3.bf16.msra.mxu0 %v847_v26 }
  0x71   :  { %776 = vmatprep.subr.bf16.mxu0 %v1014_v23 }
  0x72   :  { %739 = vmatpush3.bf16.msra.mxu1 %v839_v17 }
  0x73   :  { %740 = vmatprep.subr.bf16.mxu1 %v840_v18 }
  0x74   :  { %777 = vmatpush3.bf16.msra.mxu0 %v848_v27 }
  0x75   :  { %778 = vmatprep.subr.bf16.mxu0 %v1014_v23 }
  0x76   :  { %741 = vmatpush3.bf16.msra.mxu1 %v841_v19 }
  0x77   :  { %742 = vmatprep.subr.bf16.mxu1 %v842_v20 }
  0x78   :  { %779 = vmatpush3.bf16.msra.mxu0 %v849_v49 }
  0x79   :  { %780 = vmatprep.subr.bf16.mxu0 %v1014_v23 }
  0x7a   :  { %743 = vmatpush3.bf16.msra.mxu1 %v843_v21 }
  0x7b   :  { %788 = vmatprep.subr.bf16.mxu1 %v1014_v23 }
  0x7c   :  { %781 = vmatpush3.bf16.msra.mxu0 %v850_v50 }
  0x7d   :  { %782 = vmatprep.subr.bf16.mxu0 %v1014_v23 }
  0x80   :  { %783 = vmatpush3.bf16.msra.mxu0 %v851_v51 }
 0x136   :  { %v183_v35 = vpop.f32.mrb[0].mxu0 }
 0x137   :  { %v184_v36 = vadd.f32 %v183_v35, %v113_v33  ;;  %v185_v37 = vpop.f32.mrb[1].mxu0  ;;  %v858_v35 = vld [vmem:[#allocation10 + $0x30] sm:$0xff]  }
 0x138   :  { %v186_v38 = vadd.f32 %v185_v37, %v117_v34  ;;  %v187_v39 = vpop.f32.mrb[2].mxu0 }
 0x139   :  { %v188_v40 = vadd.f32 %v187_v39, %v113_v33  ;;  %v189_v41 = vpop.f32.mrb[3].mxu0  ;;  %v192_v43 = vmax.f32 %v184_v36, 0.0  ;;  %v856_v33 = vld [vmem:[#allocation10 + $0x20] sm:$0xff]   ;;  %v859_v36 = vld [vmem:[#allocation10 + $0x38] sm:$0xff]  }
 0x13a   :  { %v190_v42 = vadd.f32 %v189_v41, %v117_v34  ;;  %v193_v45 = vmax.f32 %v186_v38, 0.0  ;;  %v857_v34 = vld [vmem:[#allocation10 + $0x28] sm:$0xff]  }
 0x13b   :  { %v194_v44 = vmax.f32 %v188_v40, 0.0 }
 0x13c   :  { %v195_v46 = vmax.f32 %v190_v42, 0.0 }
 0x13d   :  { %v196_v47 = vpack.c.bf16 %v194_v44, %v192_v43 }
 0x13e   :  { %v197_v48 = vpack.c.bf16 %v195_v46, %v193_v45 }
 0x140   :  { %365 = vmatprep.mubr.bf16.mxu1 %v197_v48 }
 0x141   :  { %366 = vmatmul.mubr.bf16.vlgmr.msra.gmra.mrb[0].mxu1 %v196_v47 }
 0x142   :  { %804 = vmatprep.mubr.msk.bf16.mxu1 %vm1015_vm1, %v1014_v23  ;;  %789 = vmatpush3.bf16.msra.mxu1 %v852_v12 }
 0x143   :  { %790 = vmatprep.subr.bf16.mxu1 %v1014_v23 }
 0x146   :  { %791 = vmatpush3.bf16.msra.mxu1 %v853_v30 }
 0x147   :  { %792 = vmatprep.subr.bf16.mxu1 %v1014_v23 }
 0x14a   :  { %793 = vmatpush3.bf16.msra.mxu1 %v854_v31 }
 0x14b   :  { %794 = vmatprep.subr.bf16.mxu1 %v1014_v23 }
 0x14e   :  { %795 = vmatpush3.bf16.msra.mxu1 %v855_v32 }
 0x14f   :  { %796 = vmatprep.subr.bf16.mxu1 %v1014_v23 }
 0x152   :  { %797 = vmatpush3.bf16.msra.mxu1 %v856_v33 }
 0x153   :  { %798 = vmatprep.subr.bf16.mxu1 %v1014_v23 }
 0x156   :  { %799 = vmatpush3.bf16.msra.mxu1 %v857_v34 }
 0x157   :  { %800 = vmatprep.subr.bf16.mxu1 %v1014_v23 }
 0x15a   :  { %801 = vmatpush3.bf16.msra.mxu1 %v858_v35 }
 0x15b   :  { %802 = vmatprep.subr.bf16.mxu1 %v1014_v23 }
 0x15e   :  { %803 = vmatpush3.bf16.msra.mxu1 %v859_v36 }
 0x214   :  { %v744_v52 = vpop.f32.mrb[0].mxu1 }
 0x215   :  { %v745_v54 = vpop.f32.mrb[1].mxu1 }
 0x216   :  { %v746_v55 = vadd.f32 %v745_v54, %v744_v52  ;;  %v747_v56 = vpop.f32.mrb[2].mxu1 }
 0x217   :  { %v748_v57 = vpop.f32.mrb[3].mxu1 }
 0x218   :  { %v368_v58 = vadd.f32 %v746_v55, %v684_v53  ;;  %v749_v59 = vadd.f32 %v748_v57, %v747_v56 }
 0x21a   :  { %v371_v60 = vadd.f32 %v749_v59, %v684_v53  ;;  %v374_v61 = vmax.f32 %v368_v58, 0.0  ;;  %v710_v53 = vld [vmem:[%s1211_s8] ss:$0 sm:$0xff] }
 0x21c   :  { %v375_v62 = vmax.f32 %v371_v60, 0.0 }
 0x21e   :  { %v376_v63 = vpack.c.bf16 %v375_v62, %v374_v61 }
 0x220   :  { %785 = vmatmul.mubr.bf16.vlgmr.msra.gmra.mrb[4].mxu0 %v376_v63 }
 0x2f3   :  { %v482_v2 = vpop.f32.mrb[4].mxu0 }
 0x2f4   :  { %v483_v3 = vadd.f32 %v701_v1, %v482_v2  ;;  %v786_v4 = vpop.f32.mrb[5].mxu0 }
 0x2f5   :  { %v485_v5 = vpop.f32.mrb[6].mxu0 }
 0x2f6   :  { %v489_v6 = vmax.f32 %v483_v3, 0.0  ;;  %v486_v7 = vadd.f32 %v701_v1, %v485_v5  ;;  %v787_v8 = vpop.f32.mrb[7].mxu0 }
 0x2f8   :  { %v490_v9 = vmax.f32 %v486_v7, 0.0  ;;  %494 = vadd.xlane.f32.xlu0 %v489_v6  ;;  %v498_v10 = vsel %vm493_vm2, %v489_v6, 0.0 }
 0x2f9   :  { %500 = vadd.xlane.f32.xlu1 %v498_v10 }
 0x2fa   :  { %v499_v11 = vsel %vm493_vm2, %v490_v9, 0.0 }
 0x2fc   :  { %496 = vadd.xlane.f32.xlu0 %v490_v9 }
 0x2fd   :  { %502 = vadd.xlane.f32.xlu1 %v499_v11 }
 0x385   :  { %v495_v13 = vpop.xlane.xlu0 %494 }
 0x386   :  { %v501_v14 = vpop.xlane.xlu1 %500 }
 0x387   :  { %v504_v15 = vsub.f32 %v495_v13, %v501_v14 }
 0x389   :  { %v506_v16 = vsel %vm493_vm2, %v501_v14, %v504_v15  ;;  %v497_v17 = vpop.xlane.xlu0 %496 }
 0x38a   :  { %v508_v18 = vmul.f32 0.015625, %v506_v16  ;;  %v503_v19 = vpop.xlane.xlu1 %502 }
 0x38b   :  { %v505_v20 = vsub.f32 %v497_v17, %v503_v19 }
 0x38c   :  { %v510_v21 = vsub.f32 %v489_v6, %v508_v18 }
 0x38d   :  { %v507_v22 = vsel %vm493_vm2, %v503_v19, %v505_v20 }
 0x38e   :  { %v509_v24 = vmul.f32 0.015625, %v507_v22  ;;  %v512_v25 = vmul.f32 %v510_v21, %v510_v21 }
 0x390   :  { %514 = vadd.xlane.f32.xlu0 %v512_v25  ;;  %v511_v26 = vsub.f32 %v490_v9, %v509_v24  ;;  %v518_v28 = vsel %vm493_vm2, %v512_v25, 0.0 }
 0x392   :  { %v513_v27 = vmul.f32 %v511_v26, %v511_v26 }
 0x394   :  { %520 = vadd.xlane.f32.xlu0 %v518_v28  ;;  %516 = vadd.xlane.f32.xlu1 %v513_v27  ;;  %v519_v29 = vsel %vm493_vm2, %v513_v27, 0.0 }
 0x398   :  { %522 = vadd.xlane.f32.xlu1 %v519_v29 }
 0x41d   :  { %v515_v37 = vpop.xlane.xlu0 %514 }
 0x421   :  { %v521_v38 = vpop.xlane.xlu0 %520  ;;  %v517_v39 = vpop.xlane.xlu1 %516 }
 0x422   :  { %v524_v40 = vsub.f32 %v515_v37, %v521_v38 }
 0x424   :  { %v526_v41 = vsel %vm493_vm2, %v521_v38, %v524_v40 }
 0x425   :  { %v528_v42 = vmul.f32 0.015625, %v526_v41  ;;  %v523_v43 = vpop.xlane.xlu1 %522 }
 0x426   :  { %v525_v44 = vsub.f32 %v517_v39, %v523_v43 }
 0x427   :  { %v530_v45 = vadd.f32 1e-05, %v528_v42 }
 0x428   :  { %v527_v46 = vsel %vm493_vm2, %v523_v43, %v525_v44 }
 0x429   :  { %v529_v47 = vmul.f32 0.015625, %v527_v46  ;;  %860 = vrsqrt.f32 %v530_v45 }
 0x42b   :  { %v531_v48 = vadd.f32 1e-05, %v529_v47 }
 0x42d   :  { %862 = vrsqrt.f32 %v531_v48 }
 0x433   :  { %v861_v23 = vpop.eup %860 }
 0x434   :  { %v534_v50 = vmul.f32 %v861_v23, %v510_v21 }
 0x437   :  { %v863_v49 = vpop.eup %862 }
 0x438   :  { %v535_v51 = vmul.f32 %v863_v49, %v511_v26 }
 0x43a   :  { %v536_v52 = vpack.c.bf16 %v535_v51, %v534_v50 }
 0x43c   :  { %805 = vmatmul.mubr.bf16.vlgmr.msra.gmra.mrb[4].mxu1 %v536_v52 }
 0x50f   :  { %v642_v54 = vpop.f32.mrb[4].mxu1 }
 0x510   :  { %v806_v55 = vpop.f32.mrb[5].mxu1  ;;  %v643_v57 = vadd.f32 %v710_v53, %v642_v54 }
 0x511   :  { %v645_v56 = vpop.f32.mrb[6].mxu1 }
 0x512   :  { %v646_v58 = vadd.f32 %v710_v53, %v645_v56  ;;  %v807_v59 = vpop.f32.mrb[7].mxu1 }
 0x514   :  { %v726_v60 = vpack.c.bf16 %v646_v58, %v643_v57 }
 0x516   :  { %727 = vst [vmem:[#allocation11] sm:$0xff] %v726_v60  }
 0x517   :  { %985 = shalt.err (!%p982_p2)
}
 0x518   :  { %s986_s16 = scalar_lea.hbm %s1212_s9, 128 }
 0x519   :  { %p987_p3 = scmp.ne.s32.totalorder %s1212_s9, %s986_s16  ;;  %p990_p4 = scmp.lt.u32.totalorder %s986_s16, %s1212_s9 }
 0x51b   :  { %p992_p5 = pnand %p990_p4, %p987_p3 }
 0x51d   :  { %995 = shalt.err (!%p992_p5)
}
 0x51e   :  { %670 = dma.vmem_to_hbm [thread:$0]  %s665_s13, 128, %s1212_s9, [#allocation4], %s1009_s10, %s1009_s10, %s1010_s14  }
 0x51f   :  { %1002 = dma.done.wait [#allocation4], 128  }
 0x520   :  { %1003 = vsyncadd [#allocation4], 4294967168 }
 0x521   :  { %674 = vsyncpa [#allocation3], 1 }
 0x522   :  { %675 = vsyncpa [#allocation6], 1 }
 0x523   :  { %676 = vsyncpa [#allocation9], 1 }
 0x524   :  { %677 = vsyncpa [#allocation4], 1 }

</bundles_post_ra>
